<compile_context>
chip_gen: v7x
topology: tpu7x:2x2x1
jax: 0.10.0
libtpu: 0.0.40
codegen_flags: <defaults>
</compile_context>

<pallas_src>
import functools

import jax
import jax.numpy as jnp
import numpy as np
from jax.experimental import pallas as pl
from jax.experimental.pallas import tpu as pltpu


# ---------------------------------------------------------------------------
# In-kernel math (shared by both kernel variants).
# ---------------------------------------------------------------------------
def _softmax_last(x):
    x = x - jnp.max(x, axis=-1, keepdims=True)
    e = jnp.exp(x)
    # Per-row reciprocal on the EUP fast path instead of a full divide.
    # Relative error is a few 1e-4 at most -> negligible behind the sigmoid.
    return e * pl.reciprocal(jnp.sum(e, axis=-1, keepdims=True), approx=True)


def _jsd_tile(pred_ref, soft_ref):
    # TODO(synk): on v6e/v7x the 2x exp + log + sigmoid per element saturate
    # the single EUP slot before HBM; a bf16-exp variant (invalid on v5e, no
    # bf16 EUP there) would roughly halve transcendental cost on the 'sum' path.
    # TODO(synk): for C < 128 a lane-packing layout ([N, C] -> [N/k, k*C] with
    # segmented roll-reduces) would recover the 128/C x lane utilization loss.
    p = _softmax_last(pred_ref[...].astype(jnp.float32))
    t = _softmax_last(soft_ref[...].astype(jnp.float32))
    new = 0.5 * (p + t)
    # 0.5 * (new*(log(new)-p) + new*(log(new)-t)) == new * (log(new) - new)
    return jax.nn.sigmoid(new * (jnp.log(new) - new))


# ---------------------------------------------------------------------------
# Kernel variants.
# ---------------------------------------------------------------------------
def _js_map_kernel(*refs, has_weight):
    """reduction='none': write the per-element JSD map, weight & scale fused."""
    if has_weight:
        scale_ref, pred_ref, soft_ref, w_ref, out_ref = refs
    else:
        scale_ref, pred_ref, soft_ref, out_ref = refs
    jsd = _jsd_tile(pred_ref, soft_ref)
    if has_weight:
        # w block is (tile_n, 1) or (tile_n, C); broadcast is a free VPU op.
        jsd = jsd * w_ref[...].astype(jnp.float32)
    # loss_weight (and scalar weight) fused here: no post-hoc XLA rescale pass.
    out_ref[...] = (jsd * scale_ref[0]).astype(out_ref.dtype)
    # Rows past N in a ragged last block are dropped by the partial write-back.


def _js_sum_kernel(*refs, tile_n, n_valid, has_weight):
    """reduction='mean'/'sum': lane-dense (1, C) accumulator resident in the
    output block across the (sequential) row-tile grid; no map ever hits HBM."""
    if has_weight:
        pred_ref, soft_ref, w_ref, acc_ref = refs
    else:
        pred_ref, soft_ref, acc_ref = refs
    i = pl.program_id(0)

    @pl.when(i == 0)
    def _():
        acc_ref[...] = jnp.zeros_like(acc_ref)

    jsd = _jsd_tile(pred_ref, soft_ref)
    if has_weight:
        jsd = jsd * w_ref[...].astype(jnp.float32)
    if n_valid % tile_n != 0:
        # Only needed when the last block is ragged (garbage rows must not
        # pollute the sum). Trace-time check keeps the full-block case clean.
        row = i * tile_n + jax.lax.broadcasted_iota(jnp.int32, jsd.shape, 0)
        jsd = jnp.where(row < n_valid, jsd, 0.0)
    # Only a row (sublane) reduce inside the loop; the tiny cross-lane sum of
    # the (1, C) accumulator happens once in the wrapper.
    acc_ref[...] += jnp.sum(jsd, axis=0, keepdims=True)


# ---------------------------------------------------------------------------
# Wrapper helpers.
# ---------------------------------------------------------------------------
def _vmem_capacity_bytes():
    """Chip-aware physical VMEM size (v5e/v6e: 128 MiB, v7x: 64 MiB)."""
    try:
        return int(pltpu.get_tpu_info().vmem_capacity_bytes)
    except Exception:                              # pragma: no cover
        return 64 * 1024 * 1024                    # conservative (v7x) fallback


def _pick_tile_n(n, c, n_blocked, vmem_limit_bytes, tile_n=None):
    """Largest row tile whose double-buffered blocks AND the ~6 tile-sized f32
    intermediates (p, t, e, new, log(new), jsd) stay inside the scoped limit."""
    n_rounded = ((n + 7) // 8) * 8
    if tile_n is None:
        bytes_per_row = (2 * n_blocked + 6) * c * 4
        budget = int(0.75 * vmem_limit_bytes)
        tile_n = budget // max(1, bytes_per_row)
    # 512-row tiles already reach ~85% of the HBM roofline; larger tiles only
    # add VMEM pressure (v7x risk) for <~1% gain.
    tile_n = min(int(tile_n), 512, n_rounded)
    tile_n = max(8, (tile_n // 8) * 8)             # (8,128) sublane constraint
    return tile_n


# ---------------------------------------------------------------------------
# Public entry point.
# ---------------------------------------------------------------------------
def js_loss_pallas(pred, soft_label, weight=None, reduction='mean',
                   avg_factor=None, loss_weight=1.0, tile_n=None,
                   out_dtype=jnp.float32):
    assert pred.shape == soft_label.shape
    assert pred.ndim == 2
    n, c = pred.shape

    # Normalize the optional element-wise weight WITHOUT materializing an
    # (N, C) broadcast in HBM: scalars fold into the fused scale, (N,)/(N, 1)
    # weights stream as a single (tile_n, 1) column, (N, C) streams as-is.
    scale = loss_weight
    if weight is not None:
        weight = jnp.asarray(weight, jnp.float32)
        if weight.ndim == 0:
            scale = scale * weight
            weight = None
        elif weight.ndim == 1:
            assert weight.shape[0] == n
            weight = weight.reshape(n, 1)
        else:
            assert weight.shape in ((n, 1), (n, c)), weight.shape
    has_weight = weight is not None

    vmem_cap = _vmem_capacity_bytes()
    vmem_limit = min(max(vmem_cap // 2, 32 * 1024 * 1024), vmem_cap)

    n_blocked = 2 + (1 if has_weight else 0) + (1 if reduction == 'none' else 0)
    tile_n = _pick_tile_n(n, c, n_blocked, vmem_limit, tile_n)
    num_tiles = pl.cdiv(n, tile_n)

    # Vocab-scale-C guard: if double-buffered row blocks would not fit the
    # scoped VMEM limit, fall back to single buffering of the inputs.
    block_bytes = tile_n * c * jnp.dtype(pred.dtype).itemsize
    single_buffer = 2 * n_blocked * block_bytes > int(0.6 * vmem_limit)
    if single_buffer:
        row_spec = pl.BlockSpec((tile_n, c), lambda i: (i, 0),
                                pipeline_mode=pl.Buffered(1))
    else:
        row_spec = pl.BlockSpec((tile_n, c), lambda i: (i, 0))
    out_row_spec = pl.BlockSpec((tile_n, c), lambda i: (i, 0))

    w_spec = None
    if has_weight:
        wc = weight.shape[1]
        w_spec = pl.BlockSpec((tile_n, wc), lambda i: (i, 0))

    if reduction == 'none':
        # TODO(synk): on v7x, pltpu.CORE_PARALLEL on this axis would split row
        # tiles across the 2 TensorCores; kept PARALLEL for portability.
        cparams = pltpu.CompilerParams(
            dimension_semantics=(pltpu.PARALLEL,),
            vmem_limit_bytes=vmem_limit,
        )
        # loss_weight (and any scalar weight) ride in SMEM -> one compiled
        # kernel across loss_weight values, zero runtime cost.
        scale_arr = jnp.full((1,), scale, dtype=jnp.float32)
        in_specs = ([pl.BlockSpec(memory_space=pltpu.MemorySpace.SMEM),
                     row_spec, row_spec]
                    + ([w_spec] if has_weight else []))
        inputs = (scale_arr, pred, soft_label) + ((weight,) if has_weight else ())
        kernel = functools.partial(_js_map_kernel, has_weight=has_weight)
        # TODO(synk): on v5e, pass out_dtype=jnp.bfloat16 when callers accept it
        # to halve output HBM bytes (numerics then differ from the f32 reference).
        jsd_map = pl.pallas_call(
            kernel,
            out_shape=jax.ShapeDtypeStruct((n, c), out_dtype),
            grid_spec=pltpu.PrefetchScalarGridSpec(
                num_scalar_prefetch=0,
                grid=(num_tiles,),
                in_specs=in_specs,
                out_specs=out_row_spec,
            ),
            compiler_params=cparams,
        )(*inputs)
        # mmdet weight_reduce_loss silently ignores avg_factor for 'none'.
        return jsd_map

    # 'mean' / 'sum': only a single lane-dense (1, C) row of partial sums ever
    # leaves the kernel; the accumulator output block stays resident, so the
    # grid axis must be 'arbitrary' (sequential).
    kernel = functools.partial(_js_sum_kernel, tile_n=tile_n, n_valid=n,
                               has_weight=has_weight)
    in_specs = [row_spec, row_spec] + ([w_spec] if has_weight else [])
    inputs = (pred, soft_label) + ((weight,) if has_weight else ())
    lane_sums = pl.pallas_call(
        kernel,
        out_shape=jax.ShapeDtypeStruct((1, c), jnp.float32),
        grid_spec=pltpu.PrefetchScalarGridSpec(
            num_scalar_prefetch=0,
            grid=(num_tiles,),
            in_specs=in_specs,
            out_specs=pl.BlockSpec((1, c), lambda i: (0, 0)),
        ),
        compiler_params=pltpu.CompilerParams(
            dimension_semantics=(pltpu.ARBITRARY,),
            vmem_limit_bytes=vmem_limit,
        ),
    )(*inputs)
    total = jnp.sum(lane_sums)

    if reduction == 'sum':
        if avg_factor is not None:
            raise ValueError('avg_factor can not be used with reduction="sum"')
        loss = total
    elif reduction == 'mean':
        loss = total / (n * c) if avg_factor is None else total / avg_factor
    else:
        raise ValueError(reduction)
    # scale == loss_weight (x scalar weight, if given); applying it to the
    # reduced scalar here is mathematically identical to the fused version.
    return scale * loss


class JSLoss:
    """JAX/Pallas port of mmdet JSLoss (forward only, no parameters)."""

    def __init__(self, reduction='mean', loss_weight=1.0):
        self.reduction = reduction
        self.loss_weight = loss_weight

    def __call__(self, pred, soft_label, weight=None, avg_factor=None,
                 reduction_override=None):
        assert reduction_override in (None, 'none', 'mean', 'sum')
        reduction = reduction_override if reduction_override else self.reduction
        return js_loss_pallas(pred, soft_label, weight=weight,
                              reduction=reduction, avg_factor=avg_factor,
                              loss_weight=self.loss_weight)


# ---------------------------------------------------------------------------
# Pure-JAX reference (mirrors the PyTorch module).
# ---------------------------------------------------------------------------
def _js_ref(pred, soft_label):
    p = jax.nn.softmax(pred, axis=1)
    t = jax.nn.softmax(soft_label, axis=1)
    new = 0.5 * (p + t)
    kl1 = new * (jnp.log(new) - p)
    kl2 = new * (jnp.log(new) - t)
    return jax.nn.sigmoid(0.5 * (kl1 + kl2))


if __name__ == "__main__":
    key = jax.random.PRNGKey(0)
    k1, k2, k3, k4 = jax.random.split(key, 4)
    # Small, deliberately ragged N (not a multiple of 8) to exercise the
    # partial-last-block path without any wrapper-side padding.
    N, C = 13, 32
    pred = jax.random.normal(k1, (N, C), dtype=jnp.float32)
    soft_label = jax.random.normal(k2, (N, C), dtype=jnp.float32)
    w_col = jax.random.uniform(k3, (N, 1), dtype=jnp.float32)
    w_row = jax.random.uniform(k4, (N,), dtype=jnp.float32)   # (N,) per-sample

    ref_map = _js_ref(pred, soft_label)

    loss_mod = JSLoss(reduction='mean', loss_weight=1.0)

    out_mean = jax.block_until_ready(loss_mod(pred, soft_label))
    out_sum = jax.block_until_ready(
        loss_mod(pred, soft_label, reduction_override='sum'))
    out_none = jax.block_until_ready(
        loss_mod(pred, soft_label, reduction_override='none'))
    out_wmean = jax.block_until_ready(
        loss_mod(pred, soft_label, weight=w_col))
    out_w1d = jax.block_until_ready(
        loss_mod(pred, soft_label, weight=w_row))
    out_avgf = jax.block_until_ready(
        loss_mod(pred, soft_label, avg_factor=7.0))

    # Fused loss_weight + element weight on the 'none' path.
    loss_mod2 = JSLoss(reduction='none', loss_weight=2.0)
    out_none_w = jax.block_until_ready(loss_mod2(pred, soft_label, weight=w_col))

    # Multi-tile + ragged-last-block path of the resident-accumulator kernel.
    out_sum_tiled = jax.block_until_ready(
        js_loss_pallas(pred, soft_label, reduction='sum', tile_n=8))

    # Tolerances absorb the approximate per-row reciprocal in the softmax.
    RTOL, ATOL = 5e-3, 2e-3
    np.testing.assert_allclose(np.asarray(out_none), np.asarray(ref_map),
                               rtol=RTOL, atol=ATOL)
    np.testing.assert_allclose(np.asarray(out_mean), float(jnp.mean(ref_map)),
                               rtol=RTOL, atol=ATOL)
    np.testing.assert_allclose(np.asarray(out_sum), float(jnp.sum(ref_map)),
                               rtol=RTOL, atol=ATOL)
    np.testing.assert_allclose(np.asarray(out_wmean),
                               float(jnp.mean(ref_map * w_col)),
                               rtol=RTOL, atol=ATOL)
    np.testing.assert_allclose(np.asarray(out_w1d),
                               float(jnp.mean(ref_map * w_row[:, None])),
                               rtol=RTOL, atol=ATOL)
    np.testing.assert_allclose(np.asarray(out_avgf),
                               float(jnp.sum(ref_map) / 7.0),
                               rtol=RTOL, atol=ATOL)
    np.testing.assert_allclose(np.asarray(out_none_w),
                               np.asarray(2.0 * ref_map * w_col),
                               rtol=RTOL, atol=ATOL)
    np.testing.assert_allclose(np.asarray(out_sum_tiled),
                               float(jnp.sum(ref_map)),
                               rtol=RTOL, atol=ATOL)

    print("KERNEL_OK")
</pallas_src>

<mosaic_0001>
module attributes {stable_mosaic.version = 11 : i64} {
  func.func @_js_sum_kernel(%arg0: i32, %arg1: memref<16x32xf32, #tpu.memory_space<vmem>>, %arg2: memref<16x32xf32, #tpu.memory_space<vmem>>, %arg3: memref<1x32xf32, #tpu.memory_space<vmem>>) attributes {dimension_semantics = [#tpu.dimension_semantics<arbitrary>], iteration_bounds = array<i64: 1>, scalar_prefetch = 0 : i64, scratch_operands = 0 : i64, tpu.core_type = #tpu.core_type<tc>, window_params = [{transform_indices = @transform_0, window_bounds = array<i64: 16, 32>}, {transform_indices = @transform_1, window_bounds = array<i64: 16, 32>}, {pipeline_mode = #tpu.pipeline_mode<synchronous>, transform_indices = @transform_2, window_bounds = array<i64: 1, 32>}]} {
    %c0_i32 = arith.constant 0 : i32
    %0 = arith.cmpi eq, %arg0, %c0_i32 : i32
    %1 = arith.extui %0 : i1 to i32
    %c0_i32_0 = arith.constant 0 : i32
    %2 = arith.cmpi ne, %1, %c0_i32_0 : i32
    scf.if %2 {
      %cst_15 = arith.constant 0.000000e+00 : f32
      %49 = vector.broadcast %cst_15 : f32 to vector<1x32xf32>
      %c0_16 = arith.constant 0 : index
      %c0_17 = arith.constant 0 : index
      %50 = vector.load %arg3[%c0_16, %c0_17] : memref<1x32xf32, #tpu.memory_space<vmem>>, vector<1x32xf32>
      tpu.vector_store %arg3[%c0_16, %c0_17], %49 {strides = array<i32>} : memref<1x32xf32, #tpu.memory_space<vmem>>, vector<1x32xf32>,
    } else {
    }
    %c0 = arith.constant 0 : index
    %c0_1 = arith.constant 0 : index
    %3 = vector.load %arg1[%c0, %c0_1] : memref<16x32xf32, #tpu.memory_space<vmem>>, vector<16x32xf32>
    %cst = arith.constant dense<0xFF800000> : vector<16xf32>
    %4 = vector.multi_reduction <maximumf>, %3, %cst [1] : vector<16x32xf32> to vector<16xf32>
    %5 = vector.shape_cast %4 : vector<16xf32> to vector<16x1xf32>
    %6 = vector.broadcast %5 : vector<16x1xf32> to vector<16x32xf32>
    %7 = arith.subf %3, %6 : vector<16x32xf32>
    %8 = math.exp %7 : vector<16x32xf32>
    %cst_2 = arith.constant dense<0.000000e+00> : vector<16xf32>
    %9 = vector.multi_reduction <add>, %8, %cst_2 [1] : vector<16x32xf32> to vector<16xf32>
    %10 = vector.shape_cast %9 : vector<16xf32> to vector<16x1xf32>
    %11 = tpu.reciprocal %10 {approx = true} : vector<16x1xf32> -> vector<16x1xf32>
    %12 = vector.broadcast %11 : vector<16x1xf32> to vector<16x32xf32>
    %13 = arith.mulf %8, %12 : vector<16x32xf32>
    %c0_3 = arith.constant 0 : index
    %c0_4 = arith.constant 0 : index
    %14 = vector.load %arg2[%c0_3, %c0_4] : memref<16x32xf32, #tpu.memory_space<vmem>>, vector<16x32xf32>
    %cst_5 = arith.constant dense<0xFF800000> : vector<16xf32>
    %15 = vector.multi_reduction <maximumf>, %14, %cst_5 [1] : vector<16x32xf32> to vector<16xf32>
    %16 = vector.shape_cast %15 : vector<16xf32> to vector<16x1xf32>
    %17 = vector.broadcast %16 : vector<16x1xf32> to vector<16x32xf32>
    %18 = arith.subf %14, %17 : vector<16x32xf32>
    %19 = math.exp %18 : vector<16x32xf32>
    %cst_6 = arith.constant dense<0.000000e+00> : vector<16xf32>
    %20 = vector.multi_reduction <add>, %19, %cst_6 [1] : vector<16x32xf32> to vector<16xf32>
    %21 = vector.shape_cast %20 : vector<16xf32> to vector<16x1xf32>
    %22 = tpu.reciprocal %21 {approx = true} : vector<16x1xf32> -> vector<16x1xf32>
    %23 = vector.broadcast %22 : vector<16x1xf32> to vector<16x32xf32>
    %24 = arith.mulf %19, %23 : vector<16x32xf32>
    %25 = arith.addf %13, %24 : vector<16x32xf32>
    %cst_7 = arith.constant 5.000000e-01 : f32
    %26 = vector.broadcast %cst_7 : f32 to vector<16x32xf32>
    %27 = arith.mulf %26, %25 : vector<16x32xf32>
    %28 = math.log %27 : vector<16x32xf32>
    %29 = arith.subf %28, %27 : vector<16x32xf32>
    %30 = arith.mulf %27, %29 : vector<16x32xf32>
    %31 = arith.negf %30 : vector<16x32xf32>
    %32 = math.exp %31 : vector<16x32xf32>
    %cst_8 = arith.constant 1.000000e+00 : f32
    %33 = vector.broadcast %cst_8 : f32 to vector<16x32xf32>
    %34 = arith.addf %33, %32 : vector<16x32xf32>
    %35 = arith.divf %33, %34 : vector<16x32xf32>
    %c16_i32 = arith.constant 16 : i32
    %36 = arith.muli %arg0, %c16_i32 : i32
    %37 = tpu.iota {dimensions = array<i32: 0>} : vector<16x32xi32>
    %38 = vector.broadcast %36 : i32 to vector<16x32xi32>
    %39 = arith.addi %38, %37 : vector<16x32xi32>
    %c13_i32 = arith.constant 13 : i32
    %40 = vector.broadcast %c13_i32 : i32 to vector<16x32xi32>
    %41 = arith.cmpi slt, %39, %40 : vector<16x32xi32>
    %cst_9 = arith.constant 0.000000e+00 : f32
    %42 = vector.broadcast %cst_9 : f32 to vector<16x32xf32>
    %43 = arith.select %41, %35, %42 : vector<16x32xi1>, vector<16x32xf32>
    %c0_10 = arith.constant 0 : index
    %c0_11 = arith.constant 0 : index
    %44 = vector.load %arg3[%c0_10, %c0_11] : memref<1x32xf32, #tpu.memory_space<vmem>>, vector<1x32xf32>
    %cst_12 = arith.constant dense<0.000000e+00> : vector<32xf32>
    %45 = vector.multi_reduction <add>, %43, %cst_12 [0] : vector<16x32xf32> to vector<32xf32>
    %46 = vector.shape_cast %45 : vector<32xf32> to vector<1x32xf32>
    %47 = arith.addf %44, %46 : vector<1x32xf32>
    %c0_13 = arith.constant 0 : index
    %c0_14 = arith.constant 0 : index
    %48 = vector.load %arg3[%c0_13, %c0_14] : memref<1x32xf32, #tpu.memory_space<vmem>>, vector<1x32xf32>
    tpu.vector_store %arg3[%c0_13, %c0_14], %47 {strides = array<i32>} : memref<1x32xf32, #tpu.memory_space<vmem>>, vector<1x32xf32>,
    return
  }
  func.func @transform_0(%arg0: i32) -> (i32, i32) {
    %c0_i32 = arith.constant 0 : i32
    %c0_i32_0 = arith.constant 0 : i32
    return %arg0, %c0_i32 : i32, i32
  }
  func.func @transform_1(%arg0: i32) -> (i32, i32) {
    %c0_i32 = arith.constant 0 : i32
    %c0_i32_0 = arith.constant 0 : i32
    return %arg0, %c0_i32 : i32, i32
  }
  func.func @transform_2(%arg0: i32) -> (i32, i32) {
    %c0_i32 = arith.constant 0 : i32
    %c0_i32_0 = arith.constant 0 : i32
    %c0_i32_1 = arith.constant 0 : i32
    return %c0_i32, %c0_i32_0 : i32, i32
  }
}

</mosaic_0001>

<bundles_post_ra>
// kernel: tpu_custom_call.1
= control target key start
LH: loop header
LB: loop body
LE: loop exit
PB: predicated region body
PF: predicated region fallthrough
CT: control target
= control target key end

     0   :  { %7 = vsyncpa [#allocation3], 0  ;;  %s336_s0 = inlined_call_operand.hbm [shape: f32[13,32], index: 0, kind: input, shape index: {}]   ;;  %s337_s1 = inlined_call_operand.hbm [shape: f32[13,32], index: 1, kind: input, shape index: {}]   ;;  %s338_s2 = inlined_call_operand.hbm [shape: f32[1,32], index: 2, kind: output, shape index: {}]  }
   0x1   :  { %8 = vsyncpa [#allocation6], 0 }
   0x2   :  { %9 = vsyncpa [#allocation4], 0  ;;  %s267_s9 = smov [#allocation2]   ;;  %s195_s13 = scalar_lea.hbm %s336_s0, 256 }
   0x3   :  { %s15_s10 = sshll.u32 %s267_s9, 4  ;;  %p196_p0 = scmp.ne.s32.totalorder %s336_s0, %s195_s13  ;;  %s16_s10 = int_to_ptr.vmem [resolvable:$true] %s15_s10 }
   0x4   :  { %p199_p1 = scmp.lt.u32.totalorder %s195_s13, %s336_s0 }
   0x6   :  { %p201_p2 = pnand %p199_p1, %p196_p0 }
   0x8   :  { %204 = shalt.err (!%p201_p2)
}
   0x9   :  { %s205_s18 = scalar_lea.vmem %s16_s10, 256  ;;  %p210_p4 = scmp.lt.s32.totalorder %s16_s10, %s16_s10 }
   0xa   :  { %p206_p3 = scmp.ne.s32.totalorder %s16_s10, %s205_s18  ;;  %p211_p5 = scmp.lt.s32.totalorder %s205_s18, %s205_s18 }
   0xc   :  { %p212_p6 = por %p211_p5, %p210_p4 }
   0xe   :  { %p213_p7 = pnand %p212_p6, %p206_p3 }
  0x10   :  { %216 = shalt.err (!%p213_p7)
}
  0x11   :  { %s268_s19 = smov 128   ;;  %s269_s20 = smov 8  }
  0x12   :  { %21 = dma.hbm_to_vmem [thread:$0]  %s336_s0, 256, %s16_s10, [#allocation3], %s268_s19, %s268_s19, %s269_s20  }
  0x13   :  { %s270_s23 = smov [#allocation5]   ;;  %s217_s27 = scalar_lea.hbm %s337_s1, 256 }
  0x14   :  { %s27_s24 = sshll.u32 %s270_s23, 4  ;;  %p218_p8 = scmp.ne.s32.totalorder %s337_s1, %s217_s27  ;;  %s28_s24 = int_to_ptr.vmem [resolvable:$true] %s27_s24 }
  0x15   :  { %p221_p9 = scmp.lt.u32.totalorder %s217_s27, %s337_s1 }
  0x17   :  { %p223_p10 = pnand %p221_p9, %p218_p8 }
  0x19   :  { %226 = shalt.err (!%p223_p10)
}
  0x1a   :  { %s227_s4 = scalar_lea.vmem %s28_s24, 256  ;;  %p232_p12 = scmp.lt.s32.totalorder %s28_s24, %s28_s24 }
  0x1b   :  { %p228_p11 = scmp.ne.s32.totalorder %s28_s24, %s227_s4  ;;  %p233_p13 = scmp.lt.s32.totalorder %s227_s4, %s227_s4 }
  0x1d   :  { %p234_p0 = por %p233_p13, %p232_p12 }
  0x1f   :  { %p235_p1 = pnand %p234_p0, %p228_p11 }
  0x21   :  { %238 = shalt.err (!%p235_p1)
}
  0x22   :  { %33 = dma.hbm_to_vmem [thread:$0]  %s337_s1, 256, %s28_s24, [#allocation6], %s268_s19, %s268_s19, %s269_s20  }
  0x23   :  { %261 = dma.done.wait [#allocation3], 256  }
  0x24   :  { %262 = vsyncadd [#allocation3], 4294967040 }
  0x25   :  { %263 = dma.done.wait [#allocation6], 256  }
  0x26   :  { %264 = vsyncadd [#allocation6], 4294967040  ;;  %vm48_vm0 = vcmask 261120   ;;  %v47_v0 = vld [vmem:[#allocation2 + $0x8] sm:$0xff]  ;;  %v72_v1 = vld [vmem:[#allocation5 + $0x8] sm:$0xff]  ;;  %vm44_vm1 = vcmask 253952   ;;  %v120_v55 = vlaneseq }
  0x27   :  { %v46_v2 = vld [vmem:[#allocation2] sm:$0xff]  ;;  %v52_v3 = vsel %vm48_vm0, %v47_v0, -inf  ;;  %v71_v5 = vld [vmem:[#allocation5] sm:$0xff]  ;;  %v76_v6 = vsel %vm48_vm0, %v72_v1, -inf  ;;  %v271_v28 = vmov 0.0   ;;  %s272_s1 = smov [#allocation7]  }
  0x28   :  { %v49_v4 = vsel %vm48_vm0, %v46_v2, -inf  ;;  %53 = vmax.xlane.f32.xlu0 %v52_v3  ;;  %v73_v7 = vsel %vm48_vm0, %v71_v5, -inf  ;;  %45 = vst.msk [vmem:[#allocation7] sm:$0x1] %vm44_vm1, %v271_v28  ;;  %v121_v59 = vshrl.u32 %v120_v55, 7  ;;  %s149_s6 = sshll.u32 %s272_s1, 4  ;;  %s150_s6 = int_to_ptr.vmem [resolvable:$true] %s149_s6 }
  0x29   :  { %50 = vmax.xlane.f32.xlu1 %v49_v4  ;;  %s239_s7 = scalar_lea.vmem %s150_s6, 16  ;;  %s243_s8 = scalar_lea.vmem %s150_s6, 32 }
  0x2a   :  { %v122_v61 = vadd.s32 8, %v121_v59  ;;  %p240_p2 = scmp.ne.s32.totalorder %s150_s6, %s239_s7  ;;  %p244_p3 = scmp.lt.s32.totalorder %s150_s6, %s150_s6 }
  0x2b   :  { %p245_p4 = scmp.lt.s32.totalorder %s243_s8, %s239_s7 }
  0x2c   :  { %77 = vmax.xlane.f32.xlu0 %v76_v6  ;;  %vm127_vm2 = vcmp.lt.s32.totalorder %v122_v61, 13 }
  0x2d   :  { %74 = vmax.xlane.f32.xlu1 %v73_v7  ;;  %p246_p5 = por %p245_p4, %p244_p3 }
  0x2f   :  { %p247_p6 = pnand %p246_p5, %p240_p2 }
  0xb5   :  { %v54_v8 = vpop.xlane.xlu0 %53 }
  0xb6   :  { %v51_v9 = vpop.xlane.xlu1 %50  ;;  %v56_v10 = vsub.f32 %v47_v0, %v54_v8 }
  0xb7   :  { %v55_v11 = vsub.f32 %v46_v2, %v51_v9  ;;  %v130_v9 = vld [vmem:[#allocation7] sm:$0x1] }
  0xb8   :  { %v59_v12 = vmul.f32 1.442695, %v56_v10 }
  0xb9   :  { %v57_v13 = vmul.f32 1.442695, %v55_v11  ;;  %v78_v14 = vpop.xlane.xlu0 %77 }
  0xba   :  { %v75_v15 = vpop.xlane.xlu1 %74  ;;  %167 = vpow2.f32 %v59_v12  ;;  %v80_v16 = vsub.f32 %v72_v1, %v78_v14 }
  0xbb   :  { %v79_v17 = vsub.f32 %v71_v5, %v75_v15  ;;  %169 = vpow2.f32 %v57_v13 }
  0xbc   :  { %v83_v18 = vmul.f32 1.442695, %v80_v16 }
  0xbd   :  { %v81_v19 = vmul.f32 1.442695, %v79_v17 }
  0xbe   :  { %171 = vpow2.f32 %v83_v18 }
  0xbf   :  { %173 = vpow2.f32 %v81_v19 }
  0xc4   :  { %v168_v20 = vpop.eup %167 }
  0xc5   :  { %v170_v21 = vpop.eup %169  ;;  %v64_v22 = vsel %vm48_vm0, %v168_v20, 0.0 }
  0xc6   :  { %65 = vadd.xlane.f32.xlu0 %v64_v22  ;;  %v61_v23 = vsel %vm48_vm0, %v170_v21, 0.0 }
  0xc8   :  { %v172_v24 = vpop.eup %171 }
  0xc9   :  { %v174_v25 = vpop.eup %173  ;;  %v88_v26 = vsel %vm48_vm0, %v172_v24, 0.0 }
  0xca   :  { %89 = vadd.xlane.f32.xlu1 %v88_v26  ;;  %62 = vadd.xlane.f32.xlu0 %v61_v23  ;;  %v85_v27 = vsel %vm48_vm0, %v174_v25, 0.0 }
  0xce   :  { %86 = vadd.xlane.f32.xlu1 %v85_v27 }
 0x153   :  { %v66_v29 = vpop.xlane.xlu0 %65 }
 0x154   :  { %175 = vrcp.f32 %v66_v29 }
 0x157   :  { %v63_v30 = vpop.xlane.xlu0 %62  ;;  %v90_v31 = vpop.xlane.xlu1 %89 }
 0x158   :  { %177 = vrcp.f32 %v90_v31 }
 0x159   :  { %179 = vrcp.f32 %v63_v30 }
 0x15b   :  { %v87_v32 = vpop.xlane.xlu1 %86 }
 0x15c   :  { %181 = vrcp.f32 %v87_v32 }
 0x15e   :  { %v176_v33 = vpop.eup %175 }
 0x15f   :  { %v70_v36 = vmul.f32 %v176_v33, %v168_v20 }
 0x162   :  { %v178_v34 = vpop.eup %177 }
 0x163   :  { %v180_v35 = vpop.eup %179  ;;  %v94_v37 = vmul.f32 %v178_v34, %v172_v24 }
 0x164   :  { %v69_v40 = vmul.f32 %v180_v35, %v170_v21 }
 0x165   :  { %v96_v39 = vadd.f32 %v94_v37, %v70_v36 }
 0x166   :  { %v182_v38 = vpop.eup %181 }
 0x167   :  { %v93_v41 = vmul.f32 %v182_v38, %v174_v25  ;;  %v98_v42 = vmul.f32 0.5, %v96_v39 }
 0x169   :  { %v95_v43 = vadd.f32 %v93_v41, %v69_v40  ;;  %183 = vlog2.f32 %v98_v42 }
 0x16b   :  { %v97_v44 = vmul.f32 0.5, %v95_v43 }
 0x16d   :  { %185 = vlog2.f32 %v97_v44 }
 0x173   :  { %v184_v45 = vpop.eup %183 }
 0x174   :  { %v102_v46 = vmul.f32 0.6931472, %v184_v45 }
 0x176   :  { %v104_v48 = vsub.f32 %v102_v46, %v98_v42 }
 0x177   :  { %v186_v47 = vpop.eup %185 }
 0x178   :  { %v100_v49 = vmul.f32 0.6931472, %v186_v47  ;;  %v106_v50 = vmul.f32 %v104_v48, %v98_v42 }
 0x17a   :  { %v103_v51 = vsub.f32 %v100_v49, %v97_v44  ;;  %v160_v52 = vmul.f32 -1.442695, %v106_v50 }
 0x17c   :  { %v105_v53 = vmul.f32 %v103_v51, %v97_v44  ;;  %187 = vpow2.f32 %v160_v52 }
 0x17e   :  { %v159_v54 = vmul.f32 -1.442695, %v105_v53 }
 0x180   :  { %189 = vpow2.f32 %v159_v54 }
 0x186   :  { %v188_v56 = vpop.eup %187 }
 0x187   :  { %v114_v57 = vadd.f32 1.0, %v188_v56 }
 0x189   :  { %191 = vrcp.f32 %v114_v57 }
 0x18a   :  { %v190_v58 = vpop.eup %189 }
 0x18b   :  { %v113_v60 = vadd.f32 1.0, %v190_v58 }
 0x18d   :  { %193 = vrcp.f32 %v113_v60 }
 0x193   :  { %v192_v62 = vpop.eup %191 }
 0x194   :  { %v129_v63 = vsel %vm127_vm2, %v192_v62, 0.0 }
 0x195   :  { %v132_v2 = vsel %vm48_vm0, %v129_v63, 0.0 }
 0x197   :  { %v194_v0 = vpop.eup %193 }
 0x198   :  { %v131_v1 = vsel %vm48_vm0, %v194_v0, 0.0 }
 0x199   :  { %v133_v3 = vadd.f32 %v132_v2, %v131_v1 }
 0x19b   :  { %v134_v4 = vrot.slane %v133_v3, 4 }
 0x19d   :  { %v135_v5 = vadd.f32 %v134_v4, %v133_v3 }
 0x19f   :  { %v136_v6 = vrot.slane %v135_v5, 2 }
 0x1a1   :  { %v137_v7 = vadd.f32 %v136_v6, %v135_v5 }
 0x1a3   :  { %v138_v8 = vrot.slane %v137_v7, 1 }
 0x1a5   :  { %v139_v10 = vadd.f32 %v138_v8, %v137_v7 }
 0x1a7   :  { %v140_v11 = vadd.f32 %v139_v10, %v130_v9 }
 0x1a9   :  { %142 = vst.msk [vmem:[#allocation7] sm:$0x1] %vm44_vm1, %v140_v11 }
 0x1aa   :  { %250 = shalt.err (!%p247_p6)
}
 0x1ab   :  { %s251_s11 = scalar_lea.hbm %s338_s2, 16 }
 0x1ac   :  { %p252_p7 = scmp.ne.s32.totalorder %s338_s2, %s251_s11  ;;  %p255_p8 = scmp.lt.u32.totalorder %s251_s11, %s338_s2 }
 0x1ae   :  { %p257_p9 = pnand %p255_p8, %p252_p7 }
 0x1b0   :  { %260 = shalt.err (!%p257_p9)
}
 0x1b1   :  { %152 = dma.vmem_to_hbm [thread:$0]  %s150_s6, 16, %s338_s2, [#allocation4]  }
 0x1b2   :  { %265 = dma.done.wait [#allocation4], 16  }
 0x1b3   :  { %266 = vsyncadd [#allocation4], 4294967280 }
 0x1b4   :  { %156 = vsyncpa [#allocation3], 1 }
 0x1b5   :  { %157 = vsyncpa [#allocation6], 1 }
 0x1b6   :  { %158 = vsyncpa [#allocation4], 1 }

</bundles_post_ra>
